<compile_context>
chip_gen: v6e
topology: v6e:2x2x1
jax: 0.10.0
libtpu: 0.0.40
codegen_flags: <defaults>
</compile_context>

<pallas_src>
import functools

import jax
import jax.numpy as jnp
from jax.experimental import pallas as pl
from jax.experimental.pallas import tpu as pltpu


def _se_kernel(x_ref, w1_ref, w2n_ref, o_ref, acc_ref, *, hw_total, hw_tile, mask_hw):
    # x_ref:   (bpt, C, hw_tile)  streamed tile of x (native dtype)
    # w1_ref:  (C, hidden)        fc1 weight, pre-transposed (resident)
    # w2n_ref: (hidden, K)        fc2 prototypes, pre-normalized+transposed (resident)
    # o_ref:   (bpt, K)           softmax attention weights
    # acc_ref: (bpt, C) f32       pooled-sum accumulator (scratch)
    j = pl.program_id(1)
    last = pl.num_programs(1) - 1

    @pl.when(j == 0)
    def _init():
        acc_ref[...] = jnp.zeros_like(acc_ref)

    # ---- streaming global-average-pool: accumulate partial sums in f32 ----
    if mask_hw:  # static: only emitted when HW % hw_tile != 0
        @pl.when(j != last)
        def _accum():
            # common path: no mask -> ~2 VPU ops / element (convert + add)
            acc_ref[...] += jnp.sum(x_ref[...].astype(jnp.float32), axis=-1)

        @pl.when(j == last)
        def _accum_tail():
            # masked tail: iota/compare/select only on the final HW tile
            x = x_ref[...].astype(jnp.float32)
            lane = jax.lax.broadcasted_iota(jnp.int32, x.shape, dimension=2)
            x = jnp.where(j * hw_tile + lane < hw_total, x, 0.0)
            acc_ref[...] += jnp.sum(x, axis=-1)
    else:
        acc_ref[...] += jnp.sum(x_ref[...].astype(jnp.float32), axis=-1)

    # ---- finalize on the last HW tile ----
    @pl.when(j == last)
    def _finalize():
        eps = 1e-12
        # exact mean: single divide by the true H*W (not per-tile means)
        pooled = acc_ref[...] * (1.0 / hw_total)                              # (bpt, C)

        # fc1: 1x1 conv, no bias  ==  pooled @ W1^T   (w1_ref already transposed)
        h = jnp.dot(pooled, w1_ref[...].astype(jnp.float32),
                    preferred_element_type=jnp.float32)                       # (bpt, hidden)

        # F.normalize(v) = v / max(||v||, eps) = v * rsqrt(max(||v||^2, eps^2))
        hn = h * jax.lax.rsqrt(
            jnp.maximum(jnp.sum(h * h, axis=-1, keepdims=True), eps * eps))

        # fc2 prototypes already L2-normalized in the wrapper (input-independent)
        logits = jnp.dot(hn, w2n_ref[...].astype(jnp.float32),
                         preferred_element_type=jnp.float32)                  # (bpt, K)

        # softmax over K (max-subtracted); exact reciprocal -> rows sum to 1
        m = jnp.max(logits, axis=-1, keepdims=True)
        e = jnp.exp(logits - m)
        s = jnp.sum(e, axis=-1, keepdims=True)
        o_ref[...] = (e * pl.reciprocal(s, approx=False)).astype(o_ref.dtype)


def _tpu_generation():
    """Best-effort TPU generation (5 / 6 / 7); 0 if unknown."""
    try:
        kind = jax.devices()[0].device_kind.lower()
    except Exception:
        return 0
    for g in (7, 6, 5):
        if "v%d" % g in kind:
            return g
    return 0


def _gen_params():
    gen = _tpu_generation()
    if gen >= 7:   # v7x: 64 MiB VMEM/TC, 2 TCs/chip -> modest blocks, split batch axis
        return dict(x_block_budget=2 << 20, vmem_limit=48 << 20, min_batch_tiles=2)
    if gen == 6:   # v6e: 128 MiB VMEM, 1 TC -> bigger blocks amortize ~0.35us/step
        return dict(x_block_budget=6 << 20, vmem_limit=64 << 20, min_batch_tiles=1)
    if gen == 5:   # v5e: 128 MiB physical, 16 MiB scoped default -> raise explicitly
        return dict(x_block_budget=4 << 20, vmem_limit=48 << 20, min_batch_tiles=1)
    return dict(x_block_budget=2 << 20, vmem_limit=32 << 20, min_batch_tiles=1)


def _choose_tiles(B, C, HW, itemsize, *, lane_tile_max=2048,
                  x_block_budget_bytes=2 * 1024 * 1024, min_batch_tiles=1):
    """Pick (batches_per_tile, hw_tile) such that
       * hw_tile == HW (full extent) or a multiple of 128,
       * bpt == B (full extent) or a multiple of 8,
       * the byte budget is respected AFTER all rounding whenever possible,
       * when min_batch_tiles > 1 (v7x megacore) the batch axis yields at
         least that many row tiles if that is expressible with legal blocks."""
    def bytes_of(bpt, hw):
        return bpt * C * hw * itemsize

    # Candidate hw tiles, largest first: the full extent (single lane tile),
    # then decreasing multiples of 128 (these enable the masked-tail path).
    cands = []
    if HW <= lane_tile_max:
        cands.append(HW)
    hw = min(lane_tile_max, (HW // 128) * 128)
    while hw >= 128:
        if hw not in cands:
            cands.append(hw)
        hw = (hw // 2 // 128) * 128
    if not cands:           # HW < 128: full extent is the only legal choice
        cands = [HW]

    # Megacore: cap bpt so there are >= min_batch_tiles row blocks, but only
    # when that still allows a multiple-of-8 (legal) batch block.
    bpt_cap = B
    if min_batch_tiles > 1 and B >= 8 * min_batch_tiles:
        bpt_cap = max(8, (pl.cdiv(B, min_batch_tiles) // 8) * 8)

    for hw_tile in cands:
        fit = x_block_budget_bytes // max(1, C * hw_tile * itemsize)
        bpt = min(fit, bpt_cap)
        if bpt >= B:
            return B, int(hw_tile)            # full-batch block (fits budget & cap)
        bpt = (bpt // 8) * 8                  # round DOWN to a multiple of 8 sublanes
        if bpt >= 8 and bytes_of(bpt, hw_tile) <= x_block_budget_bytes:
            return int(bpt), int(hw_tile)

    # Nothing fits the budget: fall back to the smallest legal block; the
    # caller raises vmem_limit_bytes to cover it.
    return (B if B < 8 else 8), int(cands[-1])


def se_module_forward(x_nchw, w1, w2):
    """x_nchw: (B, C, H, W); w1: (hidden, C) fc1 1x1-conv weight; w2: (K, hidden).
    Returns the (B, K) softmax attention weights in float32."""
    B, C, H, W = x_nchw.shape
    HW = H * W
    hidden = w1.shape[0]
    K = w2.shape[0]
    itemsize = jnp.dtype(x_nchw.dtype).itemsize
    eps = 1e-12

    x3 = x_nchw.reshape(B, C, HW)                    # stream at native dtype (bf16 => 2x BW)
    w1t = jnp.asarray(w1, jnp.float32).T             # (C, hidden)  transpose-free MXU feed
    w2f = jnp.asarray(w2, jnp.float32)
    # F.normalize(fc2_weight) is input-independent -> do it once here.
    w2n = w2f * jax.lax.rsqrt(
        jnp.maximum(jnp.sum(w2f * w2f, axis=1, keepdims=True), eps * eps))
    w2n_t = w2n.T                                    # (hidden, K)

    cfg = _gen_params()
    weight_bytes = (C * hidden + hidden * K) * 4
    # The grid-invariant weights are still double-buffered by the pipeline;
    # reserve for them (plus slop for the output block and accumulator) before
    # sizing the x stream.
    # TODO(synk): use pipeline_mode=pl.Buffered(1) on the weight specs once
    # single-buffering grid-invariant inputs is universally supported.
    reserved = 2 * weight_bytes + (1 << 20)
    x_budget = max(256 << 10,
                   min(cfg["x_block_budget"], (cfg["vmem_limit"] - reserved) // 2))

    bpt, hw_tile = _choose_tiles(B, C, HW, itemsize,
                                 lane_tile_max=2048,
                                 x_block_budget_bytes=x_budget,
                                 min_batch_tiles=cfg["min_batch_tiles"])
    n_row = pl.cdiv(B, bpt)
    n_hw = pl.cdiv(HW, hw_tile)
    mask_hw = (HW % hw_tile) != 0

    # Raise the limit only if even the minimum legal block overshoots the budget.
    x_block_bytes = bpt * C * hw_tile * itemsize
    vmem_limit = int(max(cfg["vmem_limit"],
                         2 * x_block_bytes + reserved + bpt * (C + K) * 8))

    kernel = functools.partial(_se_kernel, hw_total=HW, hw_tile=hw_tile,
                               mask_hw=mask_hw)

    # NOTE: when B % bpt != 0, the padded rows of the final batch tile read
    # unspecified data; their results are computed and then dropped by Pallas
    # (valid rows are unaffected).
    grid_spec = pltpu.PrefetchScalarGridSpec(
        num_scalar_prefetch=0,
        grid=(n_row, n_hw),                                      # HW (reduction) axis last
        in_specs=[
            pl.BlockSpec((bpt, C, hw_tile), lambda i, j: (i, 0, j)),   # x stream
            pl.BlockSpec((C, hidden), lambda i, j: (0, 0)),            # w1^T (resident)
            pl.BlockSpec((hidden, K), lambda i, j: (0, 0)),            # normalized w2^T
        ],
        out_specs=pl.BlockSpec((bpt, K), lambda i, j: (i, 0)),
        scratch_shapes=[pltpu.VMEM((bpt, C), jnp.float32)],            # pooled accumulator
    )

    cost = pl.CostEstimate(
        flops=int(B * C * HW + 2 * B * C * hidden + 2 * B * hidden * K + 8 * B * K),
        transcendentals=int(B * K + 2 * B),
        bytes_accessed=int(B * C * HW * itemsize
                           + (C * hidden + hidden * K + B * K) * 4),
    )

    return pl.pallas_call(
        kernel,
        out_shape=jax.ShapeDtypeStruct((B, K), jnp.float32),
        grid_spec=grid_spec,
        compiler_params=pltpu.CompilerParams(
            dimension_semantics=("parallel", "arbitrary"),   # batch tiles across TCs (v7x)
            vmem_limit_bytes=vmem_limit,
        ),
        cost_estimate=cost,
    )(x3, w1t, w2n_t)


def init_params(key, in_planes, ratios, K):
    hidden_planes = int(in_planes * ratios) + 1
    k1, k2 = jax.random.split(key)

    # fc1: Conv2d(in_planes, hidden, 1, bias=False), kaiming_normal_(fan_out, relu)
    fan_out = hidden_planes
    std1 = (2.0 / fan_out) ** 0.5
    w1 = std1 * jax.random.normal(k1, (hidden_planes, in_planes), dtype=jnp.float32)

    # fc2_weight: (K, hidden), xavier_uniform_
    fan_in, fan_out2 = hidden_planes, K
    bound = (6.0 / (fan_in + fan_out2)) ** 0.5
    w2 = jax.random.uniform(k2, (K, hidden_planes), dtype=jnp.float32,
                            minval=-bound, maxval=bound)
    return w1, w2


def _reference_forward(x_nchw, w1, w2, eps=1e-12):
    """Pure-JAX mirror of the PyTorch forward (f32) for correctness checks."""
    pooled = jnp.mean(x_nchw.astype(jnp.float32), axis=(2, 3))          # (B, C)
    h = pooled @ w1.astype(jnp.float32).T                               # (B, hidden)
    hn = h / jnp.maximum(jnp.linalg.norm(h, axis=-1, keepdims=True), eps)
    w2f = w2.astype(jnp.float32)
    w2n = w2f / jnp.maximum(jnp.linalg.norm(w2f, axis=-1, keepdims=True), eps)
    logits = hn @ w2n.T                                                  # (B, K)
    return jax.nn.softmax(logits, axis=-1)


if __name__ == "__main__":
    # SEModule(in_planes=4, ratios=0.25, K=4, temperature=4); temperature unused in fwd.
    B, C, H, W = 2, 4, 16, 16
    ratios, K = 0.25, 4

    key = jax.random.PRNGKey(0)
    kx, kp = jax.random.split(key)
    x = jax.random.normal(kx, (B, C, H, W), dtype=jnp.float32)
    w1, w2 = init_params(kp, C, ratios, K)

    out = jax.block_until_ready(se_module_forward(x, w1, w2))
    ref = _reference_forward(x, w1, w2)

    assert out.shape == (B, K)
    assert bool(jnp.all(jnp.isfinite(out)))
    assert jnp.allclose(jnp.sum(out, axis=1), 1.0, atol=5e-3)
    assert jnp.allclose(out, ref, atol=5e-3)

    # bf16-streamed input path (halves HBM traffic on the pooling stream).
    out_bf16 = jax.block_until_ready(se_module_forward(x.astype(jnp.bfloat16), w1, w2))
    assert out_bf16.shape == (B, K)
    assert jnp.allclose(jnp.sum(out_bf16, axis=1), 1.0, atol=5e-3)
    assert jnp.allclose(out_bf16, ref, atol=3e-2)

    print("KERNEL_OK")
</pallas_src>

<mosaic_0001>
module attributes {stable_mosaic.version = 11 : i64} {
  func.func @_se_kernel(%arg0: i32, %arg1: i32, %arg2: memref<2x4x256xf32, #tpu.memory_space<vmem>>, %arg3: memref<4x2xf32, #tpu.memory_space<vmem>>, %arg4: memref<2x4xf32, #tpu.memory_space<vmem>>, %arg5: memref<2x4xf32, #tpu.memory_space<vmem>>, %arg6: memref<2x4xf32, #tpu.memory_space<vmem>>) attributes {dimension_semantics = [#tpu.dimension_semantics<parallel>, #tpu.dimension_semantics<arbitrary>], iteration_bounds = array<i64: 1, 1>, scalar_prefetch = 0 : i64, scratch_operands = 1 : i64, tpu.core_type = #tpu.core_type<tc>, window_params = [{transform_indices = @transform_0, window_bounds = array<i64: 2, 4, 256>}, {pipeline_mode = #tpu.pipeline_mode<synchronous>, transform_indices = @transform_1, window_bounds = array<i64: 4, 2>}, {pipeline_mode = #tpu.pipeline_mode<synchronous>, transform_indices = @transform_2, window_bounds = array<i64: 2, 4>}, {transform_indices = @transform_3, window_bounds = array<i64: 2, 4>}]} {
    %c0_i32 = arith.constant 0 : i32
    %0 = arith.cmpi eq, %arg1, %c0_i32 : i32
    %1 = arith.extui %0 : i1 to i32
    %c0_i32_0 = arith.constant 0 : i32
    %2 = arith.cmpi ne, %1, %c0_i32_0 : i32
    scf.if %2 {
      %cst_9 = arith.constant 0.000000e+00 : f32
      %11 = vector.broadcast %cst_9 : f32 to vector<2x4xf32>
      %c0_10 = arith.constant 0 : index
      %c0_11 = arith.constant 0 : index
      %12 = vector.load %arg6[%c0_10, %c0_11] : memref<2x4xf32, #tpu.memory_space<vmem>>, vector<2x4xf32>
      tpu.vector_store %arg6[%c0_10, %c0_11], %11 {strides = array<i32>} : memref<2x4xf32, #tpu.memory_space<vmem>>, vector<2x4xf32>,
    } else {
    }
    %c0 = arith.constant 0 : index
    %c0_1 = arith.constant 0 : index
    %3 = vector.load %arg6[%c0, %c0_1] : memref<2x4xf32, #tpu.memory_space<vmem>>, vector<2x4xf32>
    %c0_2 = arith.constant 0 : index
    %c0_3 = arith.constant 0 : index
    %c0_4 = arith.constant 0 : index
    %4 = vector.load %arg2[%c0_2, %c0_3, %c0_4] : memref<2x4x256xf32, #tpu.memory_space<vmem>>, vector<2x4x256xf32>
    %cst = arith.constant dense<0.000000e+00> : vector<2x4xf32>
    %5 = vector.multi_reduction <add>, %4, %cst [2] : vector<2x4x256xf32> to vector<2x4xf32>
    %6 = arith.addf %3, %5 : vector<2x4xf32>
    %c0_5 = arith.constant 0 : index
    %c0_6 = arith.constant 0 : index
    %7 = vector.load %arg6[%c0_5, %c0_6] : memref<2x4xf32, #tpu.memory_space<vmem>>, vector<2x4xf32>
    tpu.vector_store %arg6[%c0_5, %c0_6], %6 {strides = array<i32>} : memref<2x4xf32, #tpu.memory_space<vmem>>, vector<2x4xf32>,
    %c0_i32_7 = arith.constant 0 : i32
    %8 = arith.cmpi eq, %arg1, %c0_i32_7 : i32
    %9 = arith.extui %8 : i1 to i32
    %c0_i32_8 = arith.constant 0 : i32
    %10 = arith.cmpi ne, %9, %c0_i32_8 : i32
    scf.if %10 {
      %c0_9 = arith.constant 0 : index
      %c0_10 = arith.constant 0 : index
      %11 = vector.load %arg6[%c0_9, %c0_10] : memref<2x4xf32, #tpu.memory_space<vmem>>, vector<2x4xf32>
      %cst_11 = arith.constant 3.906250e-03 : f32
      %12 = vector.broadcast %cst_11 : f32 to vector<2x4xf32>
      %13 = arith.mulf %11, %12 : vector<2x4xf32>
      %c0_12 = arith.constant 0 : index
      %c0_13 = arith.constant 0 : index
      %14 = vector.load %arg3[%c0_12, %c0_13] : memref<4x2xf32, #tpu.memory_space<vmem>>, vector<4x2xf32>
      %cst_14 = arith.constant dense<0.000000e+00> : vector<2x2xf32>
      %15 = tpu.matmul %13, %14, %cst_14 {dimension_numbers = #tpu.dot_dimension_numbers<[1], [0], [0], [1], [0, 0, 1, 1], [], []>} : vector<2x4xf32>, vector<4x2xf32>, vector<2x2xf32> -> vector<2x2xf32>
      %16 = arith.mulf %15, %15 : vector<2x2xf32>
      %cst_15 = arith.constant dense<0.000000e+00> : vector<2xf32>
      %17 = vector.multi_reduction <add>, %16, %cst_15 [1] : vector<2x2xf32> to vector<2xf32>
      %18 = vector.shape_cast %17 : vector<2xf32> to vector<2x1xf32>
      %cst_16 = arith.constant 1.000000e-24 : f32
      %19 = vector.broadcast %cst_16 : f32 to vector<2x1xf32>
      %20 = arith.maximumf %18, %19 : vector<2x1xf32>
      %21 = math.rsqrt %20 : vector<2x1xf32>
      %22 = vector.broadcast %21 : vector<2x1xf32> to vector<2x2xf32>
      %23 = arith.mulf %15, %22 : vector<2x2xf32>
      %c0_17 = arith.constant 0 : index
      %c0_18 = arith.constant 0 : index
      %24 = vector.load %arg4[%c0_17, %c0_18] : memref<2x4xf32, #tpu.memory_space<vmem>>, vector<2x4xf32>
      %cst_19 = arith.constant dense<0.000000e+00> : vector<2x4xf32>
      %25 = tpu.matmul %23, %24, %cst_19 {dimension_numbers = #tpu.dot_dimension_numbers<[1], [0], [0], [1], [0, 0, 1, 1], [], []>} : vector<2x2xf32>, vector<2x4xf32>, vector<2x4xf32> -> vector<2x4xf32>
      %cst_20 = arith.constant dense<0xFF800000> : vector<2xf32>
      %26 = vector.multi_reduction <maximumf>, %25, %cst_20 [1] : vector<2x4xf32> to vector<2xf32>
      %27 = vector.shape_cast %26 : vector<2xf32> to vector<2x1xf32>
      %28 = vector.broadcast %27 : vector<2x1xf32> to vector<2x4xf32>
      %29 = arith.subf %25, %28 : vector<2x4xf32>
      %30 = math.exp %29 : vector<2x4xf32>
      %cst_21 = arith.constant dense<0.000000e+00> : vector<2xf32>
      %31 = vector.multi_reduction <add>, %30, %cst_21 [1] : vector<2x4xf32> to vector<2xf32>
      %32 = vector.shape_cast %31 : vector<2xf32> to vector<2x1xf32>
      %33 = tpu.reciprocal %32 : vector<2x1xf32> -> vector<2x1xf32>
      %34 = vector.broadcast %33 : vector<2x1xf32> to vector<2x4xf32>
      %35 = arith.mulf %30, %34 : vector<2x4xf32>
      %c0_22 = arith.constant 0 : index
      %c0_23 = arith.constant 0 : index
      %36 = vector.load %arg5[%c0_22, %c0_23] : memref<2x4xf32, #tpu.memory_space<vmem>>, vector<2x4xf32>
      tpu.vector_store %arg5[%c0_22, %c0_23], %35 {strides = array<i32>} : memref<2x4xf32, #tpu.memory_space<vmem>>, vector<2x4xf32>,
    } else {
    }
    return
  }
  func.func @transform_0(%arg0: i32, %arg1: i32) -> (i32, i32, i32) {
    %c0_i32 = arith.constant 0 : i32
    %c0_i32_0 = arith.constant 0 : i32
    return %arg0, %c0_i32, %arg1 : i32, i32, i32
  }
  func.func @transform_1(%arg0: i32, %arg1: i32) -> (i32, i32) {
    %c0_i32 = arith.constant 0 : i32
    %c0_i32_0 = arith.constant 0 : i32
    %c0_i32_1 = arith.constant 0 : i32
    return %c0_i32, %c0_i32_0 : i32, i32
  }
  func.func @transform_2(%arg0: i32, %arg1: i32) -> (i32, i32) {
    %c0_i32 = arith.constant 0 : i32
    %c0_i32_0 = arith.constant 0 : i32
    %c0_i32_1 = arith.constant 0 : i32
    return %c0_i32, %c0_i32_0 : i32, i32
  }
  func.func @transform_3(%arg0: i32, %arg1: i32) -> (i32, i32) {
    %c0_i32 = arith.constant 0 : i32
    %c0_i32_0 = arith.constant 0 : i32
    return %arg0, %c0_i32 : i32, i32
  }
}

</mosaic_0001>

<bundles_post_ra>
// kernel: tpu_custom_call.1
= control target key start
LH: loop header
LB: loop body
LE: loop exit
PB: predicated region body
PF: predicated region fallthrough
CT: control target
= control target key end

     0   :  { %8 = vsyncpa [#allocation4], 0  ;;  %s394_s0 = inlined_call_operand.hbm [shape: f32[2,4,256], index: 0, kind: input, shape index: {}]   ;;  %s395_s1 = inlined_call_operand.vmem [shape: f32[4,2], index: 1, kind: input, shape index: {}]   ;;  %s396_s2 = inlined_call_operand.vmem [shape: f32[2,4], index: 2, kind: input, shape index: {}]   ;;  %s397_s3 = inlined_call_operand.hbm [shape: f32[2,4], index: 3, kind: output, shape index: {}]  }
   0x1   :  { %9 = vsyncpa [#allocation5], 0  ;;  %s346_s12 = smov [#allocation3]  }
   0x2   :  { %s15_s13 = sshll.u32 %s346_s12, 4  ;;  %s16_s13 = int_to_ptr.vmem [resolvable:$true] %s15_s13 }
   0x3   :  { %s310_s14 = scalar_lea.vmem %s16_s13, 256  ;;  %p315_p1 = scmp.lt.s32.totalorder %s16_s13, %s16_s13 }
   0x4   :  { %p311_p0 = scmp.ne.s32.totalorder %s16_s13, %s310_s14  ;;  %p316_p2 = scmp.lt.s32.totalorder %s310_s14, %s310_s14 }
   0x6   :  { %p317_p3 = por %p316_p2, %p315_p1 }
   0x8   :  { %p318_p4 = pnand %p317_p3, %p311_p0 }
   0xa   :  { %321 = shalt.err (!%p318_p4)
}
   0xb   :  { %s347_s15 = smov 128   ;;  %s348_s16 = smov 8  }
   0xc   :  { %21 = dma.hbm_to_vmem [thread:$0]  %s394_s0, 256, %s16_s13, [#allocation4], %s347_s15, %s347_s15, %s348_s16  }
   0xd   :  { %342 = dma.done.wait [#allocation4], 256  }
   0xe   :  { %343 = vsyncadd [#allocation4], 4294967040  ;;  %vm44_vm0 = vcmask 1043456   ;;  %v36_v0 = vld [vmem:[#allocation3] sm:$0xff]  ;;  %v37_v1 = vld [vmem:[#allocation3 + $0x8] sm:$0xff]  ;;  %vm33_vm1 = vcmask 25600   ;;  %v57_v12 = vlaneseq }
   0xf   :  { %v40_v2 = vcombine.high %v36_v0, %v36_v0  ;;  %v45_v3 = vsel %vm44_vm0, %v36_v0, 0.0  ;;  %v41_v4 = vcombine.high %v37_v1, %v37_v1  ;;  %v50_v6 = vsel %vm44_vm0, %v37_v1, 0.0  ;;  %v78_v11 = vld [vmem:[%s395_s1] sm:$0xf] }
  0x10   :  { %v349_v10 = vmov 0.0   ;;  %vm350_vm2 = vmmov 0   ;;  %v58_v13 = vand.u32 127, %v57_v12  ;;  %v60_v14 = vshrl.u32 %v57_v12, 7  ;;  %v164_v29 = vld [vmem:[%s396_s2] sm:$0x3] }
  0x11   :  { %v46_v5 = vsel %vm44_vm0, %v40_v2, 0.0  ;;  %v51_v7 = vsel %vm44_vm0, %v41_v4, 0.0  ;;  %34 = vst.msk [vmem:[#allocation2] sm:$0x3] %vm33_vm1, %v349_v10  ;;  %278 = vmatprep.subr.mxu0 %v349_v10  ;;  %283 = vmatprep.subr.mxu1 %v349_v10  ;;  %vm67_vm3 = vcmask 1041409   ;;  %vm79_vm4 = vcmask 31744  }
  0x12   :  { %v47_v8 = vadd.f32 %v46_v5, %v45_v3  ;;  %v52_v9 = vadd.f32 %v51_v7, %v50_v6  ;;  %279 = vmatpush3.msk.msra.mxu0 %vm44_vm0, %v78_v11  ;;  %280 = vmatprep.mubr.msk.f32.mxu0 %vm350_vm2, %v349_v10  ;;  %v61_v16 = vsub.s32 %v58_v13, %v60_v14  ;;  %vm157_vm5 = vcmask 9216   ;;  %s351_s2 = smov [#allocation6]  }
  0x13   :  { %285 = vmatprep.mubr.msk.f32.mxu1 %vm350_vm2, %v349_v10  ;;  %vm169_vm6 = vcmask 1041408   ;;  %vm165_vm7 = vcmask 15360   ;;  %s261_s21 = sshll.u32 %s351_s2, 4  ;;  %s262_s21 = int_to_ptr.vmem [resolvable:$true] %s261_s21 }
  0x14   :  { %48 = vadd.xlane.f32.xlu0 %v47_v8  ;;  %284 = vmatpush3.msk.msra.mxu1 %vm169_vm6, %v164_v29  ;;  %s322_s22 = scalar_lea.vmem %s262_s21, 32  ;;  %p327_p6 = scmp.lt.s32.totalorder %s262_s21, %s262_s21 }
  0x15   :  { %p323_p5 = scmp.ne.s32.totalorder %s262_s21, %s322_s22  ;;  %p328_p7 = scmp.lt.s32.totalorder %s322_s22, %s322_s22 }
  0x17   :  { %p329_p8 = por %p328_p7, %p327_p6 }
  0x18   :  { %53 = vadd.xlane.f32.xlu0 %v52_v9  ;;  %v35_v20 = vld [vmem:[#allocation2] sm:$0x3] }
  0x19   :  { %p330_p9 = pnand %p329_p8, %p323_p5 }
  0x9d   :  { %v49_v15 = vpop.xlane.xlu0 %48 }
  0x9e   :  { %v62_v18 = vrot.slane %v49_v15, %v61_v16 }
  0xa1   :  { %v54_v17 = vpop.xlane.xlu0 %53 }
  0xa2   :  { %v66_v19 = vrot.slane %v54_v17, %v61_v16 }
  0xa4   :  { %v68_v21 = vsel %vm67_vm3, %v66_v19, %v62_v18 }
  0xa5   :  { %v70_v22 = vadd.f32 %v68_v21, %v35_v20 }
  0xa7   :  { %72 = vst.msk [vmem:[#allocation2] sm:$0x3] %vm33_vm1, %v70_v22 }
  0xae   :  { %v76_v23 = vld [vmem:[#allocation2] sm:$0x3] }
  0xaf   :  { %v77_v24 = vmul.f32 0.00390625, %v76_v23 }
  0xb1   :  { %281 = vmatmul.mubr.msk.f32.vlgmr.msra.gmra.mxu0 %vm79_vm4, %v77_v24 }
 0x171   :  { %v152_v25 = vpop.f32.mrf.mxu0 }
 0x172   :  { %v156_v26 = vmul.f32 %v152_v25, %v152_v25 }
 0x173   :  { %v282_v27 = vpop.f32.mrf.mxu0 }
 0x174   :  { %v158_v28 = vsel %vm157_vm5, %v156_v26, 0.0 }
 0x175   :  { %159 = vadd.xlane.f32.xlu1 %v158_v28 }
 0x1fe   :  { %v160_v30 = vpop.xlane.xlu1 %159 }
 0x1ff   :  { %v161_v31 = vmax.f32 %v160_v30, 1e-24 }
 0x201   :  { %296 = vrsqrt.f32 %v161_v31 }
 0x20e   :  { %v297_v32 = vpop.eup %296 }
 0x20f   :  { %v163_v33 = vmul.f32 %v297_v32, %v152_v25 }
 0x211   :  { %286 = vmatmul.mubr.msk.f32.vlgmr.msra.gmra.mxu1 %vm165_vm7, %v163_v33 }
 0x2d1   :  { %v239_v34 = vpop.f32.mrf.mxu1 }
 0x2d2   :  { %v243_v35 = vsel %vm33_vm1, %v239_v34, -inf }
 0x2d3   :  { %244 = vmax.xlane.f32.xlu1 %v243_v35  ;;  %v287_v36 = vpop.f32.mrf.mxu1 }
 0x35c   :  { %v245_v37 = vpop.xlane.xlu1 %244 }
 0x35d   :  { %v246_v38 = vsub.f32 %v239_v34, %v245_v37 }
 0x35f   :  { %v247_v39 = vmul.f32 1.442695, %v246_v38 }
 0x361   :  { %298 = vpow2.f32 %v247_v39 }
 0x36e   :  { %v299_v40 = vpop.eup %298 }
 0x36f   :  { %v249_v41 = vsel %vm33_vm1, %v299_v40, 0.0 }
 0x370   :  { %250 = vadd.xlane.f32.xlu0 %v249_v41 }
 0x3f9   :  { %v251_v42 = vpop.xlane.xlu0 %250 }
 0x3fa   :  { %300 = vrcp.f32 %v251_v42 }
 0x407   :  { %v301_v43 = vpop.eup %300 }
 0x408   :  { %v253_v44 = vmul.f32 %v301_v43, %v299_v40 }
 0x40a   :  { %254 = vst.msk [vmem:[#allocation6] sm:$0x3] %vm33_vm1, %v253_v44 }
 0x40b   :  { %333 = shalt.err (!%p330_p9)
}
 0x40c   :  { %264 = dma.vmem_to_hbm [thread:$0]  %s262_s21, 32, %s397_s3, [#allocation5]  }
 0x40d   :  { %344 = dma.done.wait [#allocation5], 32  }
 0x40e   :  { %345 = vsyncadd [#allocation5], 4294967264 }
 0x40f   :  { %268 = vsyncpa [#allocation4], 1 }
 0x410   :  { %269 = vsyncpa [#allocation5], 1 }

</bundles_post_ra>
